<compile_context>
chip_gen: v5e
topology: v5e:2x2
jax: 0.10.0
libtpu: 0.0.40
codegen_flags: <defaults>
</compile_context>

<pallas_src>
import math

import jax
import jax.numpy as jnp
from jax.experimental import pallas as pl
from jax.experimental.pallas import tpu as pltpu

D_MODEL = 32
D_FF = 64
BATCH = 2
SEQ = 8

LANE = 128
SUBLANE = 8


def _round_up(v, m):
    return ((v + m - 1) // m) * m


# ----------------------------------------------------------- fused FFN kernel
def _ffn_kernel(x_ref, w1_ref, b1_ref, w2_ref, b2_ref, o_ref):
    # x: [bn, d_model] f32 -> bf16 for the MXU (weights already bf16)
    x = x_ref[...].astype(jnp.bfloat16)
    # w_1(x) + b_1, ReLU  -- f32 accumulation on the MXU
    h = jnp.dot(x, w1_ref[...], preferred_element_type=jnp.float32)     # [bn, d_ff_p]
    h = jnp.maximum(h + b1_ref[...], 0.0)
    # dropout == identity (eval mode)
    # w_2(h) + b_2
    o = jnp.dot(h.astype(jnp.bfloat16), w2_ref[...],
                preferred_element_type=jnp.float32)                      # [bn, d_model_p]
    o_ref[...] = (o + b2_ref[...]).astype(o_ref.dtype)


def positionwise_feed_forward(x, w1, b1, w2, b2, *, block_rows=256):
    """x: [..., d_model]  ->  [..., d_model]   (single fused pallas_call)."""
    orig_shape = x.shape
    d_model, d_ff = w1.shape
    x2d = x.reshape(-1, d_model)
    n = x2d.shape[0]

    # Lane-pad the (tiny, VMEM-resident) weights so both matmul N dims and the
    # output store are 128-lane dense.  Zero rows/cols are exact no-ops
    # (relu(0)=0 contributes nothing; padded output columns are sliced off).
    d_ff_p = _round_up(d_ff, LANE)
    d_model_p = _round_up(d_model, LANE)
    w1p = jnp.zeros((d_model, d_ff_p), jnp.bfloat16).at[:, :d_ff].set(
        w1.astype(jnp.bfloat16))
    b1p = jnp.zeros((1, d_ff_p), jnp.float32).at[:, :d_ff].set(
        b1.astype(jnp.float32))
    w2p = jnp.zeros((d_ff_p, d_model_p), jnp.bfloat16).at[:d_ff, :d_model].set(
        w2.astype(jnp.bfloat16))
    b2p = jnp.zeros((1, d_model_p), jnp.float32).at[:, :d_model].set(
        b2.astype(jnp.float32))

    # Row tile: sublane-aligned, >= 2 grid steps when possible (so v7x's two
    # TensorCores can split the "parallel" row axis), capped at block_rows to
    # bound the [bn, d_ff_p] live intermediate in vregs/VMEM.
    if n <= SUBLANE:
        bn = n                                    # single full-extent block
    else:
        half = -(-n // 2)
        bn = min(block_rows, _round_up(half, SUBLANE))
    grid = (pl.cdiv(n, bn),)                      # ragged last block is fine

    out = pl.pallas_call(
        _ffn_kernel,
        out_shape=jax.ShapeDtypeStruct((n, d_model_p), x.dtype),
        grid=grid,
        in_specs=[
            pl.BlockSpec((bn, d_model), lambda i: (i, 0)),        # x rows
            pl.BlockSpec((d_model, d_ff_p), lambda i: (0, 0)),    # w1 (resident)
            pl.BlockSpec((1, d_ff_p), lambda i: (0, 0)),          # b1 (resident)
            pl.BlockSpec((d_ff_p, d_model_p), lambda i: (0, 0)),  # w2 (resident)
            pl.BlockSpec((1, d_model_p), lambda i: (0, 0)),       # b2 (resident)
        ],
        out_specs=pl.BlockSpec((bn, d_model_p), lambda i: (i, 0)),
        compiler_params=pltpu.CompilerParams(
            dimension_semantics=("parallel",)),
    )(x2d, w1p, b1p, w2p, b2p)

    # Drop the zero-padded output lanes outside the kernel (lane-dense stores
    # inside; this slice is tiny and keeps kernel stores unmasked).
    return out[:, :d_model].reshape(orig_shape)


# ---------------------------------------------------------------- param init
def init_params(key):
    def dense(k, din, dout):
        kw, kb = jax.random.split(k)
        w = jax.random.normal(kw, (din, dout), jnp.float32) * (1.0 / math.sqrt(din))
        b = jax.random.normal(kb, (dout,), jnp.float32) * 0.01
        return w, b

    k1, k2 = jax.random.split(key)
    w1, b1 = dense(k1, D_MODEL, D_FF)
    w2, b2 = dense(k2, D_FF, D_MODEL)
    return dict(w1=w1, b1=b1, w2=w2, b2=b2)


if __name__ == "__main__":
    key = jax.random.PRNGKey(0)
    kx, kp = jax.random.split(key)

    x = jax.random.normal(kx, (BATCH, SEQ, D_MODEL), jnp.float32)   # [B, T, D]
    p = init_params(kp)

    out = positionwise_feed_forward(x, p["w1"], p["b1"], p["w2"], p["b2"])
    jax.block_until_ready(out)
    assert out.shape == (BATCH, SEQ, D_MODEL)

    # sanity check against plain-JAX f32 reference (eval-mode FFN); tolerance
    # loosened because the kernel uses bf16 operands with f32 accumulation.
    ref = jnp.maximum(x.reshape(-1, D_MODEL) @ p["w1"] + p["b1"], 0.0) @ p["w2"] + p["b2"]
    ref = ref.reshape(BATCH, SEQ, D_MODEL)
    assert jnp.allclose(out, ref, atol=5e-2, rtol=5e-2), (
        float(jnp.max(jnp.abs(out - ref))))

    print("KERNEL_OK")
</pallas_src>

<mosaic_0001>
module attributes {stable_mosaic.version = 11 : i64} {
  func.func @_ffn_kernel(%arg0: i32, %arg1: memref<8x32xf32, #tpu.memory_space<vmem>>, %arg2: memref<32x128xbf16, #tpu.memory_space<vmem>>, %arg3: memref<1x128xf32, #tpu.memory_space<vmem>>, %arg4: memref<128x128xbf16, #tpu.memory_space<vmem>>, %arg5: memref<1x128xf32, #tpu.memory_space<vmem>>, %arg6: memref<8x128xf32, #tpu.memory_space<vmem>>) attributes {dimension_semantics = [#tpu.dimension_semantics<parallel>], iteration_bounds = array<i64: 2>, scalar_prefetch = 0 : i64, scratch_operands = 0 : i64, tpu.core_type = #tpu.core_type<tc>, window_params = [{transform_indices = @transform_0, window_bounds = array<i64: 8, 32>}, {pipeline_mode = #tpu.pipeline_mode<synchronous>, transform_indices = @transform_1, window_bounds = array<i64: 32, 128>}, {pipeline_mode = #tpu.pipeline_mode<synchronous>, transform_indices = @transform_2, window_bounds = array<i64: 1, 128>}, {pipeline_mode = #tpu.pipeline_mode<synchronous>, transform_indices = @transform_3, window_bounds = array<i64: 128, 128>}, {pipeline_mode = #tpu.pipeline_mode<synchronous>, transform_indices = @transform_4, window_bounds = array<i64: 1, 128>}, {transform_indices = @transform_5, window_bounds = array<i64: 8, 128>}]} {
    %c0 = arith.constant 0 : index
    %c0_0 = arith.constant 0 : index
    %0 = vector.load %arg1[%c0, %c0_0] : memref<8x32xf32, #tpu.memory_space<vmem>>, vector<8x32xf32>
    %1 = arith.truncf %0 : vector<8x32xf32> to vector<8x32xbf16>
    %c0_1 = arith.constant 0 : index
    %c0_2 = arith.constant 0 : index
    %2 = vector.load %arg2[%c0_1, %c0_2] : memref<32x128xbf16, #tpu.memory_space<vmem>>, vector<32x128xbf16>
    %cst = arith.constant dense<0.000000e+00> : vector<8x128xf32>
    %3 = tpu.matmul %1, %2, %cst {dimension_numbers = #tpu.dot_dimension_numbers<[1], [0], [0], [1], [0, 0, 1, 1], [], []>} : vector<8x32xbf16>, vector<32x128xbf16>, vector<8x128xf32> -> vector<8x128xf32>
    %c0_3 = arith.constant 0 : index
    %c0_4 = arith.constant 0 : index
    %4 = vector.load %arg3[%c0_3, %c0_4] : memref<1x128xf32, #tpu.memory_space<vmem>>, vector<1x128xf32>
    %5 = vector.broadcast %4 : vector<1x128xf32> to vector<8x128xf32>
    %6 = arith.addf %3, %5 : vector<8x128xf32>
    %cst_5 = arith.constant 0.000000e+00 : f32
    %7 = vector.broadcast %cst_5 : f32 to vector<8x128xf32>
    %8 = arith.maximumf %6, %7 : vector<8x128xf32>
    %9 = arith.truncf %8 : vector<8x128xf32> to vector<8x128xbf16>
    %c0_6 = arith.constant 0 : index
    %c0_7 = arith.constant 0 : index
    %10 = vector.load %arg4[%c0_6, %c0_7] : memref<128x128xbf16, #tpu.memory_space<vmem>>, vector<128x128xbf16>
    %cst_8 = arith.constant dense<0.000000e+00> : vector<8x128xf32>
    %11 = tpu.matmul %9, %10, %cst_8 {dimension_numbers = #tpu.dot_dimension_numbers<[1], [0], [0], [1], [0, 0, 1, 1], [], []>} : vector<8x128xbf16>, vector<128x128xbf16>, vector<8x128xf32> -> vector<8x128xf32>
    %c0_9 = arith.constant 0 : index
    %c0_10 = arith.constant 0 : index
    %12 = vector.load %arg5[%c0_9, %c0_10] : memref<1x128xf32, #tpu.memory_space<vmem>>, vector<1x128xf32>
    %13 = vector.broadcast %12 : vector<1x128xf32> to vector<8x128xf32>
    %14 = arith.addf %11, %13 : vector<8x128xf32>
    %c0_11 = arith.constant 0 : index
    %c0_12 = arith.constant 0 : index
    %15 = vector.load %arg6[%c0_11, %c0_12] : memref<8x128xf32, #tpu.memory_space<vmem>>, vector<8x128xf32>
    tpu.vector_store %arg6[%c0_11, %c0_12], %14 {strides = array<i32>} : memref<8x128xf32, #tpu.memory_space<vmem>>, vector<8x128xf32>,
    return
  }
  func.func @transform_0(%arg0: i32) -> (i32, i32) {
    %c0_i32 = arith.constant 0 : i32
    %c0_i32_0 = arith.constant 0 : i32
    return %arg0, %c0_i32 : i32, i32
  }
  func.func @transform_1(%arg0: i32) -> (i32, i32) {
    %c0_i32 = arith.constant 0 : i32
    %c0_i32_0 = arith.constant 0 : i32
    %c0_i32_1 = arith.constant 0 : i32
    return %c0_i32, %c0_i32_0 : i32, i32
  }
  func.func @transform_2(%arg0: i32) -> (i32, i32) {
    %c0_i32 = arith.constant 0 : i32
    %c0_i32_0 = arith.constant 0 : i32
    %c0_i32_1 = arith.constant 0 : i32
    return %c0_i32, %c0_i32_0 : i32, i32
  }
  func.func @transform_3(%arg0: i32) -> (i32, i32) {
    %c0_i32 = arith.constant 0 : i32
    %c0_i32_0 = arith.constant 0 : i32
    %c0_i32_1 = arith.constant 0 : i32
    return %c0_i32, %c0_i32_0 : i32, i32
  }
  func.func @transform_4(%arg0: i32) -> (i32, i32) {
    %c0_i32 = arith.constant 0 : i32
    %c0_i32_0 = arith.constant 0 : i32
    %c0_i32_1 = arith.constant 0 : i32
    return %c0_i32, %c0_i32_0 : i32, i32
  }
  func.func @transform_5(%arg0: i32) -> (i32, i32) {
    %c0_i32 = arith.constant 0 : i32
    %c0_i32_0 = arith.constant 0 : i32
    return %arg0, %c0_i32 : i32, i32
  }
}

</mosaic_0001>

<bundles_post_ra>
// kernel: tpu_custom_call.1
= control target key start
LH: loop header
LB: loop body
LE: loop exit
PB: predicated region body
PF: predicated region fallthrough
CT: control target
= control target key end

     0   :  { %10 = vsyncpa [#allocation3], 0  ;;  %s993_s0 = inlined_call_operand.hbm [shape: f32[16,32], index: 0, kind: input, shape index: {}]   ;;  %s994_s1 = inlined_call_operand.hbm [shape: bf16[32,128], index: 1, kind: input, shape index: {}]   ;;  %s995_s2 = inlined_call_operand.vmem [shape: f32[1,128], index: 2, kind: input, shape index: {}]   ;;  %s996_s3 = inlined_call_operand.hbm [shape: bf16[128,128], index: 3, kind: input, shape index: {}]   ;;  %s997_s4 = inlined_call_operand.vmem [shape: f32[1,128], index: 4, kind: input, shape index: {}]   ;;  %s998_s5 = inlined_call_operand.hbm [shape: f32[16,128], index: 5, kind: output, shape index: {}]  }
   0x1   :  { %12 = vsyncpa [#allocation3 + $0x1], 0 }
   0x2   :  { %13 = vsyncpa [#allocation6], 0 }
   0x3   :  { %14 = vsyncpa [#allocation4], 0 }
   0x4   :  { %16 = vsyncpa [#allocation4 + $0x1], 0  ;;  %s838_s18 = smov 0   ;;  %s840_s19 = smov 0  }
   0x5   :  { %s842_s20 = smov 0   ;;  %s844_s21 = smov 0  }
   0x6 LB: > { %s174_s24 = sshll.u32 %s994_s1, 4  ;;  %s862_s25 = sadd.s32 4294967295, %s802_s21   ;;  %s802_s21 = sphi %s844_s21, %s1009_s21   ;;  %s798_s20 = sphi %s842_s20, %s1008_s20   ;;  %s794_s19 = sphi %s840_s19, %s1007_s19   ;;  %s790_s18 = sphi %s838_s18, %s1006_s18   ;;  %s175_s24 = int_to_ptr.hbm [resolvable:$true] %s174_s24 }
   0x7   : > { %p505_p0 = scmp.ge.s32.totalorder %s802_s21, 1  ;;  %p43_p1 = scmp.eq.s32.totalorder %s862_s25, 0 }
   0x8   : > { %p163_p2 = scmp.lt.s32.totalorder %s802_s21, 3  ;;  %s804_s27 = smov [#allocation5]  }
   0x9   : > { %s176_s28 = sshll.u32 %s804_s27, 4  ;;  %s191_s6 = sshll.u32 %s996_s3, 4  ;;  %s177_s28 = int_to_ptr.vmem [resolvable:$true] %s176_s28  ;;  %s192_s6 = int_to_ptr.hbm [resolvable:$true] %s191_s6 }
   0xa   : > { %p867_p3 = pnand %p505_p0, %p163_p2  ;;  %s805_s7 = smov [#allocation7]  }
   0xb   : > { %s193_s8 = sshll.u32 %s805_s7, 4  ;;  %s806_s9 = smov 64   ;;  %s194_s8 = int_to_ptr.vmem [resolvable:$true] %s193_s8 }
   0xc   : > { %p583_p4 = pneg %p867_p3  ;;  %s807_s10 = smov 4  }
   0xd   : > { %s504_s11 = sadd.s32 4294967294, %s802_s21   ;;  %s881_s12 = sadd.s32 1, %s802_s21  }
   0xe   : > { %p584_p6 = pnand %p583_p4, %p43_p1  ;;  %s26_s13 = ssub.s32 %s802_s21, %s881_s12 }
   0xf   : > { %s29_s14 = sadd.s32 1, %s798_s20  ;;  %p27_p7 = scmp.eq.s32.totalorder %s26_s13, 0 }
  0x10   : > { %586 = dma.hbm_to_vmem [thread:$0]  (!%p584_p6), %s175_s24, 256, %s177_s28, [#allocation6], %s806_s9, %s806_s9, %s807_s10  }
  0x11   : > { %589 = dma.hbm_to_vmem [thread:$0]  (!%p584_p6), %s192_s6, 1024, %s194_s8, [#allocation6], %s806_s9, %s806_s9, %s807_s10  }
  0x12   : > { %p36_p8 = scmp.ne.s32.totalorder %s798_s20, %s794_s19  ;;  %p37_p9 = scmp.eq.s32.totalorder %s802_s21, 0 }
  0x13   : > { %p42_p10 = scmp.ne.s32.totalorder %s794_s19, %s790_s18  ;;  %p150_p13 = scmp.eq.s32.totalorder %s862_s25, 1 }
  0x14   : > { %s892_s15 = scalar_select %p27_p7, %s798_s20, %s29_s14  }
  0x15   : > { %p894_p11 = por %p37_p9, %p36_p8  ;;  %p900_p12 = por %p43_p1, %p42_p10 }
  0x16   : > { %p156_p0 = scmp.eq.s32.totalorder %s504_s11, 1  ;;  %p600_p2 = scmp.lt.s32.totalorder %s802_s21, 2 }
  0x17   : > { %s210_s22 = sand.u32 1, %s798_s20   ;;  %p907_p4 = por %p150_p13, %p36_p8 }
  0x18   : > { %p911_p6 = por %p156_p0, %p42_p10  ;;  %s509_s27 = sshll.u32 %s210_s22, 3 }
  0x19   : > { %s510_s28 = sshll.u32 %s802_s21, 3  ;;  %s214_s7 = scalar_lea.vmem [#allocation2], %s509_s27 }
  0x1a   : > { %s218_s6 = scalar_lea.hbm %s993_s0, %s510_s28  ;;  %s222_s8 = sshll.u32 %s214_s7, 4  ;;  %s223_s8 = int_to_ptr.vmem [resolvable:$true] %s222_s8 }
  0x1b   : > { %s220_s9 = sshll.u32 %s218_s6, 4  ;;  %p921_p7 = pnand %p600_p2, %p894_p11  ;;  %s221_s9 = int_to_ptr.hbm [resolvable:$true] %s220_s9 }
  0x1c   : > { %s211_s11 = scalar_lea.sflag [#allocation3], %s210_s22  ;;  %s702_s13 = sshra.s32 %s221_s9, 4  ;;  %s703_s13 = int_to_ptr.hbm [resolvable:$true] %s702_s13 }
  0x1d   : > { %s704_s14 = scalar_lea.hbm %s703_s13, 8  ;;  %p706_p9 = pneg %p921_p7 }
  0x1e   : > { %p705_p8 = scmp.ne.s32.totalorder %s703_s13, %s704_s14  ;;  %s709_s29 = scalar_lea.hbm %s993_s0, 16 }
  0x1f   : > { %p710_p11 = scmp.lt.s32.totalorder %s703_s13, %s993_s0  ;;  %p711_p0 = scmp.lt.s32.totalorder %s709_s29, %s704_s14 }
  0x20   : > { %p707_p10 = pnand %p706_p9, %p705_p8 }
  0x21   : > { %p712_p2 = por %p711_p0, %p710_p11 }
  0x22   : > { %p708_p13 = pneg %p707_p10 }
  0x24   : > { %p713_p5 = pnand %p712_p2, %p708_p13 }
  0x26   : > { %716 = shalt.err (!%p713_p5)
}
  0x27   : > { %593 = dma.hbm_to_vmem [thread:$0]  (!%p921_p7), %s221_s9, 128, %s223_s8, %s211_s11  }
  0x28   : > { %231 = sbr.rel (%p867_p3) target bundleno = 322 (0x142), region = 40  ;;  %s938_s22 = sand.u32 (!%p867_p3), 1, %s794_s19  }
  0x29   : > { %s512_s6 = sshll.u32 (!%p867_p3), %s938_s22, 3  ;;  %s234_s7 = scalar_lea.sflag (!%p867_p3), [#allocation3], %s938_s22 }
  0x2a   : > { %s237_s13 = scalar_lea.vmem (!%p867_p3), [#allocation2], %s512_s6 }
  0x2d   : > { %777 = dma.done.wait (%p900_p12), %s234_s7, 128  }
  0x2e   : > { %779 = vsyncadd (%p900_p12), %s234_s7, 4294967168 }
  0x2f   : > { %781 = dma.done.wait (%p43_p1), [#allocation6], 1280  }
  0x30   : > { %783 = vsyncadd (%p43_p1), [#allocation6], 4294966016  ;;  %v562_v0 = vld [vmem:[#allocation5 + $0x8] sm:$0xff]  ;;  %v561_v2 = vld [vmem:[#allocation5] sm:$0xff]  ;;  %vm298_vm0 = vcmask 261120   ;;  %s558_s8 = sshll.u32 %s862_s25, 3 }
  0x31   : > { %v570_v1 = vld [vmem:[#allocation7 + $0x38] sm:$0xff]  ;;  %308 = vmatpush.bf16.msra.mxu0 %v562_v0  ;;  %v276_v3 = vld [vmem:[%s237_s13] sm:$0xff]  ;;  %v569_v4 = vld [vmem:[#allocation7 + $0x30] sm:$0xff]  ;;  %s410_s11 = scalar_lea.hbm %s998_s5, %s558_s8  ;;  %s274_s28 = scalar_lea.vmem [#allocation8], %s512_s6 }
  0x32   : > { %385 = vmatpush.bf16.msra.mxu1 %v570_v1  ;;  %v277_v5 = vpack.c.bf16 %v276_v3, %v276_v3  ;;  %v568_v6 = vld [vmem:[#allocation7 + $0x28] sm:$0xff]  ;;  %v567_v7 = vld [vmem:[#allocation7 + $0x20] sm:$0xff]  ;;  %v566_v8 = vld [vmem:[#allocation7 + $0x18] sm:$0xff]  ;;  %s412_s29 = sshll.u32 %s274_s28, 4  ;;  %s414_s30 = sshll.u32 %s410_s11, 4  ;;  %s413_s29 = int_to_ptr.vmem [resolvable:$true] %s412_s29  ;;  %s415_s30 = int_to_ptr.hbm [resolvable:$true] %s414_s30 }
  0x33   : > { %v565_v9 = vld [vmem:[#allocation7 + $0x10] sm:$0xff]  ;;  %v564_v10 = vld [vmem:[#allocation7 + $0x8] sm:$0xff]  ;;  %v563_v11 = vld [vmem:[#allocation7] sm:$0xff]  ;;  %s400_s16 = scalar_lea.sflag [#allocation4], %s938_s22  ;;  %s746_s25 = sshra.s32 %s415_s30, 4  ;;  %s747_s25 = int_to_ptr.hbm [resolvable:$true] %s746_s25 }
  0x34   : > { %v640_v12 = vld [vmem:[%s995_s2] ss:$0 sm:$0xff]  ;;  %s748_s7 = scalar_lea.hbm %s747_s25, 8  ;;  %s752_s17 = scalar_lea.hbm %s998_s5, 16 }
  0x35   : > { %309 = vmatpush.bf16.msra.mxu0 %v561_v2  ;;  %v641_v18 = vld [vmem:[%s997_s4] ss:$0 sm:$0xff]  ;;  %p749_p1 = scmp.ne.s32.totalorder %s747_s25, %s748_s7  ;;  %p753_p12 = scmp.lt.s32.totalorder %s747_s25, %s998_s5 }
  0x36   : > { %386 = vmatpush.bf16.msra.mxu1 %v569_v4  ;;  %p754_p7 = scmp.lt.s32.totalorder %s752_s17, %s748_s7 }
  0x37   : > { %p750_p3 = pnand %p749_p1, %p907_p4 }
  0x38   : > { %524 = vmatmul.msk.bf16.vlgmr.msra.gmra.mxu0 %vm298_vm0, %v277_v5  ;;  %p755_p8 = por %p754_p7, %p753_p12 }
  0x39   : > { %p751_p5 = pneg %p750_p3 }
  0x3a   : > { %387 = vmatpush.bf16.msra.mxu1 %v568_v6 }
  0x3b   : > { %p756_p9 = pnand %p755_p8, %p751_p5 }
  0x3e   : > { %388 = vmatpush.bf16.msra.mxu1 %v567_v7 }
  0x42   : > { %389 = vmatpush.bf16.msra.mxu1 %v566_v8 }
  0x46   : > { %390 = vmatpush.bf16.msra.mxu1 %v565_v9 }
  0x4a   : > { %391 = vmatpush.bf16.msra.mxu1 %v564_v10 }
  0x4e   : > { %392 = vmatpush.bf16.msra.mxu1 %v563_v11 }
  0xb5   : > { %v311_v13 = vpop.f32.mrf.mxu0 }
  0xb6   : > { %v312_v14 = vadd.f32 %v640_v12, %v311_v13 }
  0xb8   : > { %v315_v15 = vmax.f32 %v312_v14, 0.0 }
  0xba   : > { %v316_v16 = vpack.c.bf16 %v315_v15, %v315_v15 }
  0xbc   : > { %393 = vmatmul.bf16.vlgmr.msra.gmra.mxu1 %v316_v16 }
  0xbd   : > { %v313_v17 = vpop.f32.mrf.mxu0 }
 0x139   : > { %v394_v19 = vpop.f32.mrf.mxu1 }
 0x13a   : > { %v395_v20 = vadd.f32 %v641_v18, %v394_v19 }
 0x13c   : > { %398 = vst [vmem:[%s274_s28] sm:$0xff] %v395_v20 }
 0x13d   : > { %759 = shalt.err (!%p756_p9)
}
 0x13e   : > { %581 = dma.vmem_to_hbm [thread:$0]  (%p907_p4), %s413_s29, 128, %s415_s30, %s400_s16  }
 0x141   : > { %v396_v21 = vpop.f32.mrf.mxu1 }
 0x142 PF: > { %s426_s22 = sand.u32 1, %s790_s18   ;;  %p1005_p10 = scmp.ge.s32.totalorder %s802_s21, 2 }
 0x143   : > { %s427_s9 = scalar_lea.sflag [#allocation4], %s426_s22 }
 0x144   : > { %p595_p13 = pnand %p1005_p10, %p911_p6 }
 0x146   : > { %p596_p11 = pneg %p595_p13 }
 0x148   : > { %785 = dma.done.wait (%p596_p11), %s427_s9, 128  }
 0x149   : > { %787 = vsyncadd (%p596_p11), %s427_s9, 4294967168  ;;  %p19_p0 = scmp.ge.s32.totalorder %s881_s12, 4   ;;  %s1006_s18 = smov %s794_s19 }
 0x14a   : > { %s1007_s19 = smov %s798_s20  ;;  %s1008_s20 = smov %s892_s15 }
 0x14b   : > { %s1009_s21 = smov %s881_s12  ;;  %21 = sbr.rel (!%p19_p0) target bundleno = 6 (0x6), region = 93 }
 0x150   :  { %433 = vsyncpa [#allocation3], 1 }
 0x151   :  { %435 = vsyncpa [#allocation3 + $0x1], 1 }
 0x152   :  { %436 = vsyncpa [#allocation6], 1 }
 0x153   :  { %437 = vsyncpa [#allocation4], 1 }
 0x154   :  { %439 = vsyncpa [#allocation4 + $0x1], 1 }

</bundles_post_ra>
